<compile_context>
chip_gen: v6e
topology: v6e:2x2x1
jax: 0.10.0
libtpu: 0.0.40
codegen_flags: <defaults>
</compile_context>

<pallas_src>
import jax
import jax.numpy as jnp
from jax.experimental import pallas as pl
from jax.experimental.pallas import tpu as pltpu

K_IN = 28 * 28       # 784 (== full array dim, so no lane padding needed)
H1 = 128
H2 = 64
H2_PAD = 128         # fc2 output / fc3 input padded to a full 128-lane tile
N_OUT = 10
OUT_PAD = 128        # lane-dense padded logits width
NEG_BIG = -1.0e30    # bias for padded logit columns -> exp() underflows to 0


def _round_up(n, m):
    return ((n + m - 1) // m) * m


def mlp_kernel(x_ref, w1_ref, b1_ref, w2_ref, b2_ref, w3_ref, b3_ref, o_ref):
    # x_ref: (bt, 784) f32 or bf16; weights bf16; biases f32; o_ref: (bt, 128)
    x = x_ref[...].astype(jnp.bfloat16)   # in-kernel cast (no-op if already bf16)

    # fc1 + relu (MXU bf16, f32 accumulate)
    h1 = jnp.dot(x, w1_ref[...], preferred_element_type=jnp.float32) + b1_ref[...]
    h1 = jnp.maximum(h1, 0.0).astype(jnp.bfloat16)

    # fc2 + relu (padded to 128 cols; padded cols are relu(0 + 0) = 0)
    h2 = jnp.dot(h1, w2_ref[...], preferred_element_type=jnp.float32) + b2_ref[...]
    h2 = jnp.maximum(h2, 0.0).astype(jnp.bfloat16)

    # fc3 (padded to 128 output lanes; padded columns carry a -1e30 bias)
    logits = jnp.dot(h2, w3_ref[...], preferred_element_type=jnp.float32) + b3_ref[...]

    # log_softmax along dim=1 (numerically stable; padded cols contribute 0)
    m = jnp.max(logits, axis=-1, keepdims=True)
    shifted = logits - m
    lse = jnp.log(jnp.sum(jnp.exp(shifted), axis=-1, keepdims=True))
    o_ref[...] = (shifted - lse).astype(o_ref.dtype)


def init_params(key):
    # Deterministic init matching nn.Linear shapes; weights stored as (in, out).
    k = jax.random.split(key, 6)

    def linear(kw, kb, fan_in, fan_out):
        bound = 1.0 / jnp.sqrt(fan_in)
        w = jax.random.uniform(kw, (fan_in, fan_out), jnp.float32, -bound, bound)
        b = jax.random.uniform(kb, (1, fan_out), jnp.float32, -bound, bound)
        return w, b

    w1, b1 = linear(k[0], k[1], K_IN, H1)
    w2, b2 = linear(k[2], k[3], H1, H2)
    w3, b3 = linear(k[4], k[5], H2, N_OUT)
    return (w1, b1, w2, b2, w3, b3)


def prepare_params(params):
    """One-time pad + bf16 cast of weights for the kernel (biases stay f32)."""
    w1, b1, w2, b2, w3, b3 = params
    w1p = w1.astype(jnp.bfloat16)                                   # (784, 128)
    w2p = jnp.zeros((H1, H2_PAD), jnp.float32).at[:, :H2].set(w2).astype(jnp.bfloat16)
    b2p = jnp.zeros((1, H2_PAD), jnp.float32).at[:, :H2].set(b2)    # padded cols -> 0
    w3p = (jnp.zeros((H2_PAD, OUT_PAD), jnp.float32)
           .at[:H2, :N_OUT].set(w3).astype(jnp.bfloat16))           # padded rows/cols -> 0
    b3p = jnp.full((1, OUT_PAD), NEG_BIG, jnp.float32).at[:, :N_OUT].set(b3)
    return (w1p, b1, w2p, b2p, w3p, b3p)


def net_forward(x, prep_params, b_tile=1024, out_dtype=jnp.float32):
    """Forward pass.

    x: (B, 1, 28, 28) or (B, 784), f32 (or pre-cast bf16 to halve input HBM
    traffic).  Returns (B, 10) log-probabilities in `out_dtype` (default f32).
    """
    w1, b1, w2, b2, w3, b3 = prep_params
    B = x.shape[0]
    x = x.reshape(B, K_IN)   # flatten only; no pad, no copy, no wrapper cast

    # Batch tile: whole batch if it is small, otherwise a 16-aligned tile.
    # The ragged last grid block (B % bt != 0) is handled by Pallas; its garbage
    # rows are row-independent and never written back to the (B, ...) output.
    bt = B if B <= b_tile else _round_up(min(b_tile, B), 16)
    num_tiles = pl.cdiv(B, bt)

    x_itemsize = jnp.dtype(x.dtype).itemsize
    out_itemsize = jnp.dtype(out_dtype).itemsize
    weight_bytes = (K_IN * H1 + H1 * H2_PAD + H2_PAD * OUT_PAD) * 2 \
        + (H1 + H2_PAD + OUT_PAD) * 4

    flops = 2 * B * (K_IN * H1 + H1 * H2_PAD + H2_PAD * OUT_PAD)
    bytes_accessed = B * K_IN * x_itemsize + weight_bytes + B * OUT_PAD * out_itemsize

    # Only raise the scoped-VMEM limit when a large user-chosen tile needs it
    # (double-buffered x + out tiles, resident weights, headroom).  The default
    # bt=1024 fits the 16 MiB v5e scoped default without any override.
    vmem_est = (2 * bt * K_IN * x_itemsize + 2 * bt * OUT_PAD * out_itemsize
                + 2 * weight_bytes + (2 << 20))
    cp_kwargs = {"dimension_semantics": ("parallel",)}
    if vmem_est > (12 << 20):
        cp_kwargs["vmem_limit_bytes"] = int(min(vmem_est, 100 << 20))

    out = pl.pallas_call(
        mlp_kernel,
        out_shape=jax.ShapeDtypeStruct((B, OUT_PAD), out_dtype),
        grid=(num_tiles,),
        in_specs=[
            pl.BlockSpec((bt, K_IN), lambda i: (i, 0)),          # x: batch-tiled
            pl.BlockSpec((K_IN, H1), lambda i: (0, 0)),          # w1: VMEM-resident
            pl.BlockSpec((1, H1), lambda i: (0, 0)),             # b1
            pl.BlockSpec((H1, H2_PAD), lambda i: (0, 0)),        # w2 (padded cols)
            pl.BlockSpec((1, H2_PAD), lambda i: (0, 0)),         # b2 (padded cols = 0)
            pl.BlockSpec((H2_PAD, OUT_PAD), lambda i: (0, 0)),   # w3 (padded)
            pl.BlockSpec((1, OUT_PAD), lambda i: (0, 0)),        # b3 (padded = -1e30)
        ],
        out_specs=pl.BlockSpec((bt, OUT_PAD), lambda i: (i, 0)),
        compiler_params=pltpu.CompilerParams(**cp_kwargs),
        cost_estimate=pl.CostEstimate(
            flops=flops,
            transcendentals=B * OUT_PAD,
            bytes_accessed=bytes_accessed,
        ),
    )(x, w1, b1, w2, b2, w3, b3)

    # Lane-dense kernel output; trim the padded logit columns here.  Downstream
    # consumers that can fuse the slice may take the padded (B, 128) array instead.
    return out[:, :N_OUT]


def reference_forward_f32(x_nchw, params):
    # Pure-JAX f32 reference (PyTorch semantics).
    w1, b1, w2, b2, w3, b3 = params
    x = x_nchw.reshape(x_nchw.shape[0], -1).astype(jnp.float32)
    h1 = jnp.maximum(x @ w1 + b1, 0.0)
    h2 = jnp.maximum(h1 @ w2 + b2, 0.0)
    logits = h2 @ w3 + b3
    return jax.nn.log_softmax(logits, axis=1)


def reference_forward_bf16(x_nchw, params):
    # Pure-JAX reference using the same bf16-input / f32-accumulate recipe.
    w1, b1, w2, b2, w3, b3 = params
    x = x_nchw.reshape(x_nchw.shape[0], -1).astype(jnp.bfloat16)
    h1 = jnp.dot(x, w1.astype(jnp.bfloat16), preferred_element_type=jnp.float32) + b1
    h1 = jnp.maximum(h1, 0.0).astype(jnp.bfloat16)
    h2 = jnp.dot(h1, w2.astype(jnp.bfloat16), preferred_element_type=jnp.float32) + b2
    h2 = jnp.maximum(h2, 0.0).astype(jnp.bfloat16)
    logits = jnp.dot(h2, w3.astype(jnp.bfloat16), preferred_element_type=jnp.float32) + b3
    return jax.nn.log_softmax(logits, axis=1)


if __name__ == "__main__":
    key = jax.random.PRNGKey(0)
    kx, kp = jax.random.split(key)

    B = 8
    x = jax.random.normal(kx, (B, 1, 28, 28), jnp.float32)  # NCHW, MNIST-like
    params = init_params(kp)
    prep = prepare_params(params)

    out = jax.block_until_ready(net_forward(x, prep))

    ref_bf16 = reference_forward_bf16(x, params)
    ref_f32 = reference_forward_f32(x, params)

    assert out.shape == (B, N_OUT)
    # Tight match against the same numeric recipe (bf16 matmul, f32 accumulate).
    assert jnp.allclose(out, ref_bf16, atol=5e-3, rtol=5e-3)
    # Loose match against full-f32 PyTorch semantics (bf16 quantization error).
    assert jnp.allclose(out, ref_f32, atol=1e-1, rtol=1e-1)
    # Valid log-probabilities: rows of exp(out) sum to 1.
    assert jnp.allclose(jnp.sum(jnp.exp(out), axis=1), 1.0, atol=1e-3)

    print("KERNEL_OK")
</pallas_src>

<mosaic_0001>
module attributes {stable_mosaic.version = 11 : i64} {
  func.func @mlp_kernel(%arg0: i32, %arg1: memref<8x784xf32, #tpu.memory_space<vmem>>, %arg2: memref<784x128xbf16, #tpu.memory_space<vmem>>, %arg3: memref<1x128xf32, #tpu.memory_space<vmem>>, %arg4: memref<128x128xbf16, #tpu.memory_space<vmem>>, %arg5: memref<1x128xf32, #tpu.memory_space<vmem>>, %arg6: memref<128x128xbf16, #tpu.memory_space<vmem>>, %arg7: memref<1x128xf32, #tpu.memory_space<vmem>>, %arg8: memref<8x128xf32, #tpu.memory_space<vmem>>) attributes {dimension_semantics = [#tpu.dimension_semantics<parallel>], iteration_bounds = array<i64: 1>, scalar_prefetch = 0 : i64, scratch_operands = 0 : i64, tpu.core_type = #tpu.core_type<tc>, window_params = [{transform_indices = @transform_0, window_bounds = array<i64: 8, 784>}, {pipeline_mode = #tpu.pipeline_mode<synchronous>, transform_indices = @transform_1, window_bounds = array<i64: 784, 128>}, {pipeline_mode = #tpu.pipeline_mode<synchronous>, transform_indices = @transform_2, window_bounds = array<i64: 1, 128>}, {pipeline_mode = #tpu.pipeline_mode<synchronous>, transform_indices = @transform_3, window_bounds = array<i64: 128, 128>}, {pipeline_mode = #tpu.pipeline_mode<synchronous>, transform_indices = @transform_4, window_bounds = array<i64: 1, 128>}, {pipeline_mode = #tpu.pipeline_mode<synchronous>, transform_indices = @transform_5, window_bounds = array<i64: 128, 128>}, {pipeline_mode = #tpu.pipeline_mode<synchronous>, transform_indices = @transform_6, window_bounds = array<i64: 1, 128>}, {transform_indices = @transform_7, window_bounds = array<i64: 8, 128>}]} {
    %c0 = arith.constant 0 : index
    %c0_0 = arith.constant 0 : index
    %0 = vector.load %arg1[%c0, %c0_0] : memref<8x784xf32, #tpu.memory_space<vmem>>, vector<8x784xf32>
    %1 = arith.truncf %0 : vector<8x784xf32> to vector<8x784xbf16>
    %c0_1 = arith.constant 0 : index
    %c0_2 = arith.constant 0 : index
    %2 = vector.load %arg2[%c0_1, %c0_2] : memref<784x128xbf16, #tpu.memory_space<vmem>>, vector<784x128xbf16>
    %cst = arith.constant dense<0.000000e+00> : vector<8x128xf32>
    %3 = tpu.matmul %1, %2, %cst {dimension_numbers = #tpu.dot_dimension_numbers<[1], [0], [0], [1], [0, 0, 1, 1], [], []>} : vector<8x784xbf16>, vector<784x128xbf16>, vector<8x128xf32> -> vector<8x128xf32>
    %c0_3 = arith.constant 0 : index
    %c0_4 = arith.constant 0 : index
    %4 = vector.load %arg3[%c0_3, %c0_4] : memref<1x128xf32, #tpu.memory_space<vmem>>, vector<1x128xf32>
    %5 = vector.broadcast %4 : vector<1x128xf32> to vector<8x128xf32>
    %6 = arith.addf %3, %5 : vector<8x128xf32>
    %cst_5 = arith.constant 0.000000e+00 : f32
    %7 = vector.broadcast %cst_5 : f32 to vector<8x128xf32>
    %8 = arith.maximumf %6, %7 : vector<8x128xf32>
    %9 = arith.truncf %8 : vector<8x128xf32> to vector<8x128xbf16>
    %c0_6 = arith.constant 0 : index
    %c0_7 = arith.constant 0 : index
    %10 = vector.load %arg4[%c0_6, %c0_7] : memref<128x128xbf16, #tpu.memory_space<vmem>>, vector<128x128xbf16>
    %cst_8 = arith.constant dense<0.000000e+00> : vector<8x128xf32>
    %11 = tpu.matmul %9, %10, %cst_8 {dimension_numbers = #tpu.dot_dimension_numbers<[1], [0], [0], [1], [0, 0, 1, 1], [], []>} : vector<8x128xbf16>, vector<128x128xbf16>, vector<8x128xf32> -> vector<8x128xf32>
    %c0_9 = arith.constant 0 : index
    %c0_10 = arith.constant 0 : index
    %12 = vector.load %arg5[%c0_9, %c0_10] : memref<1x128xf32, #tpu.memory_space<vmem>>, vector<1x128xf32>
    %13 = vector.broadcast %12 : vector<1x128xf32> to vector<8x128xf32>
    %14 = arith.addf %11, %13 : vector<8x128xf32>
    %cst_11 = arith.constant 0.000000e+00 : f32
    %15 = vector.broadcast %cst_11 : f32 to vector<8x128xf32>
    %16 = arith.maximumf %14, %15 : vector<8x128xf32>
    %17 = arith.truncf %16 : vector<8x128xf32> to vector<8x128xbf16>
    %c0_12 = arith.constant 0 : index
    %c0_13 = arith.constant 0 : index
    %18 = vector.load %arg6[%c0_12, %c0_13] : memref<128x128xbf16, #tpu.memory_space<vmem>>, vector<128x128xbf16>
    %cst_14 = arith.constant dense<0.000000e+00> : vector<8x128xf32>
    %19 = tpu.matmul %17, %18, %cst_14 {dimension_numbers = #tpu.dot_dimension_numbers<[1], [0], [0], [1], [0, 0, 1, 1], [], []>} : vector<8x128xbf16>, vector<128x128xbf16>, vector<8x128xf32> -> vector<8x128xf32>
    %c0_15 = arith.constant 0 : index
    %c0_16 = arith.constant 0 : index
    %20 = vector.load %arg7[%c0_15, %c0_16] : memref<1x128xf32, #tpu.memory_space<vmem>>, vector<1x128xf32>
    %21 = vector.broadcast %20 : vector<1x128xf32> to vector<8x128xf32>
    %22 = arith.addf %19, %21 : vector<8x128xf32>
    %cst_17 = arith.constant dense<0xFF800000> : vector<8xf32>
    %23 = vector.multi_reduction <maximumf>, %22, %cst_17 [1] : vector<8x128xf32> to vector<8xf32>
    %24 = vector.shape_cast %23 : vector<8xf32> to vector<8x1xf32>
    %25 = vector.broadcast %24 : vector<8x1xf32> to vector<8x128xf32>
    %26 = arith.subf %22, %25 : vector<8x128xf32>
    %27 = math.exp %26 : vector<8x128xf32>
    %cst_18 = arith.constant dense<0.000000e+00> : vector<8xf32>
    %28 = vector.multi_reduction <add>, %27, %cst_18 [1] : vector<8x128xf32> to vector<8xf32>
    %29 = vector.shape_cast %28 : vector<8xf32> to vector<8x1xf32>
    %30 = math.log %29 : vector<8x1xf32>
    %31 = vector.broadcast %30 : vector<8x1xf32> to vector<8x128xf32>
    %32 = arith.subf %26, %31 : vector<8x128xf32>
    %c0_19 = arith.constant 0 : index
    %c0_20 = arith.constant 0 : index
    %33 = vector.load %arg8[%c0_19, %c0_20] : memref<8x128xf32, #tpu.memory_space<vmem>>, vector<8x128xf32>
    tpu.vector_store %arg8[%c0_19, %c0_20], %32 {strides = array<i32>} : memref<8x128xf32, #tpu.memory_space<vmem>>, vector<8x128xf32>,
    return
  }
  func.func @transform_0(%arg0: i32) -> (i32, i32) {
    %c0_i32 = arith.constant 0 : i32
    %c0_i32_0 = arith.constant 0 : i32
    return %arg0, %c0_i32 : i32, i32
  }
  func.func @transform_1(%arg0: i32) -> (i32, i32) {
    %c0_i32 = arith.constant 0 : i32
    %c0_i32_0 = arith.constant 0 : i32
    %c0_i32_1 = arith.constant 0 : i32
    return %c0_i32, %c0_i32_0 : i32, i32
  }
  func.func @transform_2(%arg0: i32) -> (i32, i32) {
    %c0_i32 = arith.constant 0 : i32
    %c0_i32_0 = arith.constant 0 : i32
    %c0_i32_1 = arith.constant 0 : i32
    return %c0_i32, %c0_i32_0 : i32, i32
  }
  func.func @transform_3(%arg0: i32) -> (i32, i32) {
    %c0_i32 = arith.constant 0 : i32
    %c0_i32_0 = arith.constant 0 : i32
    %c0_i32_1 = arith.constant 0 : i32
    return %c0_i32, %c0_i32_0 : i32, i32
  }
  func.func @transform_4(%arg0: i32) -> (i32, i32) {
    %c0_i32 = arith.constant 0 : i32
    %c0_i32_0 = arith.constant 0 : i32
    %c0_i32_1 = arith.constant 0 : i32
    return %c0_i32, %c0_i32_0 : i32, i32
  }
  func.func @transform_5(%arg0: i32) -> (i32, i32) {
    %c0_i32 = arith.constant 0 : i32
    %c0_i32_0 = arith.constant 0 : i32
    %c0_i32_1 = arith.constant 0 : i32
    return %c0_i32, %c0_i32_0 : i32, i32
  }
  func.func @transform_6(%arg0: i32) -> (i32, i32) {
    %c0_i32 = arith.constant 0 : i32
    %c0_i32_0 = arith.constant 0 : i32
    %c0_i32_1 = arith.constant 0 : i32
    return %c0_i32, %c0_i32_0 : i32, i32
  }
  func.func @transform_7(%arg0: i32) -> (i32, i32) {
    %c0_i32 = arith.constant 0 : i32
    %c0_i32_0 = arith.constant 0 : i32
    return %arg0, %c0_i32 : i32, i32
  }
}

</mosaic_0001>

<bundles_post_ra>
// kernel: tpu_custom_call.1
= control target key start
LH: loop header
LB: loop body
LE: loop exit
PB: predicated region body
PF: predicated region fallthrough
CT: control target
= control target key end

     0   :  { %12 = vsyncpa [#allocation3], 0  ;;  %s1404_s0 = inlined_call_operand.hbm [shape: f32[8,784], index: 0, kind: input, shape index: {}]   ;;  %s1405_s1 = inlined_call_operand.hbm [shape: bf16[784,128], index: 1, kind: input, shape index: {}]   ;;  %s1406_s2 = inlined_call_operand.vmem [shape: f32[1,128], index: 2, kind: input, shape index: {}]   ;;  %s1407_s3 = inlined_call_operand.hbm [shape: bf16[128,128], index: 3, kind: input, shape index: {}]   ;;  %s1408_s4 = inlined_call_operand.vmem [shape: f32[1,128], index: 4, kind: input, shape index: {}]   ;;  %s1409_s5 = inlined_call_operand.hbm [shape: bf16[128,128], index: 5, kind: input, shape index: {}]   ;;  %s1410_s6 = inlined_call_operand.vmem [shape: f32[1,128], index: 6, kind: input, shape index: {}]   ;;  %s1411_s7 = inlined_call_operand.hbm [shape: f32[8,128], index: 7, kind: output, shape index: {}]  }
   0x1   :  { %13 = vsyncpa [#allocation6], 0 }
   0x2   :  { %14 = vsyncpa [#allocation9], 0 }
   0x3   :  { %15 = vsyncpa [#allocation4], 0  ;;  %s1299_s24 = smov [#allocation5]  }
   0x4   :  { %s31_s25 = sshll.u32 %s1299_s24, 4  ;;  %s32_s25 = int_to_ptr.vmem [resolvable:$true] %s31_s25 }
   0x5   :  { %s1199_s26 = scalar_lea.vmem %s32_s25, 6272  ;;  %p1204_p1 = scmp.lt.s32.totalorder %s32_s25, %s32_s25 }
   0x6   :  { %p1200_p0 = scmp.ne.s32.totalorder %s32_s25, %s1199_s26  ;;  %p1205_p2 = scmp.lt.s32.totalorder %s1199_s26, %s1199_s26 }
   0x8   :  { %p1206_p3 = por %p1205_p2, %p1204_p1 }
   0xa   :  { %p1207_p4 = pnand %p1206_p3, %p1200_p0 }
   0xc   :  { %1210 = shalt.err (!%p1207_p4)
}
   0xd   :  { %s1300_s27 = smov 64   ;;  %s1301_s28 = smov 4  }
   0xe   :  { %37 = dma.hbm_to_vmem [thread:$0]  %s1405_s1, 6272, %s32_s25, [#allocation6], %s1300_s27, %s1300_s27, %s1301_s28  }
   0xf   :  { %s1302_s8 = smov [#allocation2]   ;;  %s1303_s10 = smov [#allocation7]  }
  0x10   :  { %s22_s9 = sshll.u32 %s1302_s8, 4  ;;  %s45_s11 = sshll.u32 %s1303_s10, 4  ;;  %s23_s9 = int_to_ptr.vmem [resolvable:$true] %s22_s9  ;;  %s46_s11 = int_to_ptr.vmem [resolvable:$true] %s45_s11 }
  0x11   :  { %s1219_s12 = scalar_lea.vmem %s23_s9, 896  ;;  %p1224_p6 = scmp.lt.s32.totalorder %s23_s9, %s23_s9 }
  0x12   :  { %p1220_p5 = scmp.ne.s32.totalorder %s23_s9, %s1219_s12  ;;  %p1225_p7 = scmp.lt.s32.totalorder %s1219_s12, %s1219_s12 }
  0x14   :  { %p1226_p8 = por %p1225_p7, %p1224_p6 }
  0x16   :  { %p1227_p9 = pnand %p1226_p8, %p1220_p5 }
  0x18   :  { %1230 = shalt.err (!%p1227_p9)
}
  0x19   :  { %25 = dma.hbm_to_vmem [thread:$0]  %s1404_s0, 896, %s23_s9, [#allocation3]  }
  0x1a   :  { %s1239_s15 = scalar_lea.vmem %s46_s11, 1024  ;;  %p1244_p11 = scmp.lt.s32.totalorder %s46_s11, %s46_s11 }
  0x1b   :  { %p1240_p10 = scmp.ne.s32.totalorder %s46_s11, %s1239_s15  ;;  %p1245_p12 = scmp.lt.s32.totalorder %s1239_s15, %s1239_s15 }
  0x1d   :  { %p1246_p13 = por %p1245_p12, %p1244_p11 }
  0x1f   :  { %p1247_p0 = pnand %p1246_p13, %p1240_p10 }
  0x21   :  { %1250 = shalt.err (!%p1247_p0)
}
  0x22   :  { %51 = dma.hbm_to_vmem [thread:$0]  %s1407_s3, 1024, %s46_s11, [#allocation6], %s1300_s27, %s1300_s27, %s1301_s28  }
  0x23   :  { %s1304_s17 = smov [#allocation8]  }
  0x24   :  { %s59_s18 = sshll.u32 %s1304_s17, 4  ;;  %s60_s18 = int_to_ptr.vmem [resolvable:$true] %s59_s18 }
  0x25   :  { %s1259_s19 = scalar_lea.vmem %s60_s18, 1024  ;;  %p1264_p2 = scmp.lt.s32.totalorder %s60_s18, %s60_s18 }
  0x26   :  { %p1260_p1 = scmp.ne.s32.totalorder %s60_s18, %s1259_s19  ;;  %p1265_p3 = scmp.lt.s32.totalorder %s1259_s19, %s1259_s19 }
  0x28   :  { %p1266_p4 = por %p1265_p3, %p1264_p2 }
  0x2a   :  { %p1267_p5 = pnand %p1266_p4, %p1260_p1 }
  0x2c   :  { %1270 = shalt.err (!%p1267_p5)
}
  0x2d   :  { %65 = dma.hbm_to_vmem [thread:$0]  %s1409_s5, 1024, %s60_s18, [#allocation9], %s1300_s27, %s1300_s27, %s1301_s28  }
  0x2e   :  { %1291 = dma.done.wait [#allocation3], 896  }
  0x2f   :  { %1292 = vsyncadd [#allocation3], 4294966400 }
  0x30   :  { %1293 = dma.done.wait [#allocation6], 7296  }
  0x31   :  { %1294 = vsyncadd [#allocation6], 4294960000 }
  0x32   :  { %1295 = dma.done.wait [#allocation9], 1024  }
  0x33   :  { %1296 = vsyncadd [#allocation9], 4294966272  ;;  %v1122_v0 = vld [vmem:[#allocation5 + $0x78] sm:$0xff]   ;;  %v1126_v4 = vld [vmem:[#allocation5 + $0x70] sm:$0xff]   ;;  %v1305_v44 = vmov 0.0   ;;  %vm1306_vm0 = vmmov 0  }
  0x34   :  { %v1123_v1 = vld [vmem:[#allocation5 + $0x38] sm:$0xff]   ;;  %981 = vmatprep.subr.bf16.mxu0 %v1122_v0  ;;  %v1127_v5 = vld [vmem:[#allocation5 + $0x30] sm:$0xff]   ;;  %v1130_v8 = vld [vmem:[#allocation5 + $0x68] sm:$0xff]   ;;  %vm494_vm1 = vcmask 130048  }
  0x35   :  { %v1124_v2 = vld [vmem:[#allocation5 + $0xf8] sm:$0xff]   ;;  %982 = vmatpush3.bf16.msra.mxu0 %v1123_v1  ;;  %v1128_v6 = vld [vmem:[#allocation5 + $0xf0] sm:$0xff]   ;;  %v1131_v9 = vld [vmem:[#allocation5 + $0x28] sm:$0xff]  }
  0x36   :  { %v1125_v3 = vld [vmem:[#allocation5 + $0xb8] sm:$0xff]   ;;  %1003 = vmatprep.subr.bf16.mxu1 %v1124_v2  ;;  %983 = vmatprep.subr.bf16.mxu0 %v1126_v4  ;;  %v1129_v7 = vld [vmem:[#allocation5 + $0xb0] sm:$0xff]   ;;  %v1132_v10 = vld [vmem:[#allocation5 + $0xe8] sm:$0xff]  }
  0x37   :  { %1004 = vmatpush3.bf16.msra.mxu1 %v1125_v3  ;;  %v1133_v11 = vld [vmem:[#allocation5 + $0xa8] sm:$0xff]   ;;  %v1134_v12 = vld [vmem:[#allocation5 + $0x60] sm:$0xff]   ;;  %v1138_v16 = vld [vmem:[#allocation5 + $0x58] sm:$0xff]  }
  0x38   :  { %1005 = vmatprep.subr.bf16.mxu1 %v1128_v6  ;;  %v1135_v13 = vld [vmem:[#allocation5 + $0x20] sm:$0xff]   ;;  %v1139_v17 = vld [vmem:[#allocation5 + $0x18] sm:$0xff]   ;;  %v1142_v20 = vld [vmem:[#allocation5 + $0x50] sm:$0xff]  }
  0x39   :  { %984 = vmatpush3.bf16.msra.mxu0 %v1127_v5  ;;  %v1136_v14 = vld [vmem:[#allocation5 + $0xe0] sm:$0xff]   ;;  %v1140_v18 = vld [vmem:[#allocation5 + $0xd8] sm:$0xff]   ;;  %v1143_v21 = vld [vmem:[#allocation5 + $0x10] sm:$0xff]  }
  0x3a   :  { %985 = vmatprep.subr.bf16.mxu0 %v1130_v8  ;;  %v1137_v15 = vld [vmem:[#allocation5 + $0xa0] sm:$0xff]   ;;  %v1141_v19 = vld [vmem:[#allocation5 + $0x98] sm:$0xff]   ;;  %v1144_v22 = vld [vmem:[#allocation5 + $0xd0] sm:$0xff]  }
  0x3b   :  { %1006 = vmatpush3.bf16.msra.mxu1 %v1129_v7  ;;  %v1145_v23 = vld [vmem:[#allocation5 + $0x90] sm:$0xff]   ;;  %v1146_v24 = vld [vmem:[#allocation5 + $0x48] sm:$0xff]   ;;  %v1150_v28 = vld [vmem:[#allocation5 + $0x40] sm:$0xff]  }
  0x3c   :  { %1007 = vmatprep.subr.bf16.mxu1 %v1132_v10  ;;  %v1147_v25 = vld [vmem:[#allocation5 + $0x8] sm:$0xff]   ;;  %v1151_v29 = vld [vmem:[#allocation5] sm:$0xff]   ;;  %v82_v31 = vld [vmem:[#allocation2 + $0x8] sm:$0xff] }
  0x3d   :  { %986 = vmatpush3.bf16.msra.mxu0 %v1131_v9  ;;  %v1148_v26 = vld [vmem:[#allocation5 + $0xc8] sm:$0xff]   ;;  %v1152_v30 = vld [vmem:[#allocation5 + $0xc0] sm:$0xff]   ;;  %v89_v32 = vpack.c.bf16 %v82_v31, %v82_v31  ;;  %v1154_v36 = vld [vmem:[#allocation5 + $0x178] sm:$0xff]  }
  0x3e   :  { %987 = vmatprep.subr.bf16.mxu0 %v1134_v12  ;;  %v1149_v27 = vld [vmem:[#allocation5 + $0x88] sm:$0xff]   ;;  %v1153_v33 = vld [vmem:[#allocation5 + $0x80] sm:$0xff]   ;;  %v1155_v39 = vld [vmem:[#allocation5 + $0x138] sm:$0xff]  }
  0x3f   :  { %1008 = vmatpush3.bf16.msra.mxu1 %v1133_v11  ;;  %v81_v34 = vld [vmem:[#allocation2] sm:$0xff]  ;;  %v84_v37 = vld [vmem:[#allocation2 + $0x18] sm:$0xff]  ;;  %530 = vmatprep.mubr.bf16.mxu0 %v89_v32  ;;  %v83_v40 = vld [vmem:[#allocation2 + $0x10] sm:$0xff] }
  0x40   :  { %1009 = vmatprep.subr.bf16.mxu1 %v1136_v14  ;;  %v88_v35 = vpack.c.bf16 %v81_v34, %v81_v34  ;;  %v91_v38 = vpack.c.bf16 %v84_v37, %v84_v37  ;;  %v90_v41 = vpack.c.bf16 %v83_v40, %v83_v40  ;;  %v1156_v42 = vld [vmem:[#allocation5 + $0x170] sm:$0xff]   ;;  %v1158_v45 = vld [vmem:[#allocation5 + $0x168] sm:$0xff]   ;;  %v1160_v47 = vld [vmem:[#allocation5 + $0x160] sm:$0xff]  }
  0x41   :  { %988 = vmatpush3.bf16.msra.mxu0 %v1135_v13  ;;  %v1157_v43 = vld [vmem:[#allocation5 + $0x130] sm:$0xff]   ;;  %v1159_v46 = vld [vmem:[#allocation5 + $0x128] sm:$0xff]   ;;  %v1161_v48 = vld [vmem:[#allocation5 + $0x120] sm:$0xff]  }
  0x42   :  { %989 = vmatprep.subr.bf16.mxu0 %v1138_v16  ;;  %570 = vmatprep.mubr.bf16.mxu1 %v91_v38  ;;  %v1162_v49 = vld [vmem:[#allocation5 + $0x158] sm:$0xff]   ;;  %v1164_v51 = vld [vmem:[#allocation5 + $0x150] sm:$0xff]   ;;  %v1170_v53 = vld [vmem:[#allocation5 + $0x180] sm:$0xff]  }
  0x43   :  { %1010 = vmatpush3.bf16.msra.mxu1 %v1137_v15  ;;  %v1163_v50 = vld [vmem:[#allocation5 + $0x118] sm:$0xff]   ;;  %v1165_v52 = vld [vmem:[#allocation5 + $0x110] sm:$0xff]   ;;  %v1166_v55 = vld [vmem:[#allocation5 + $0x148] sm:$0xff]  }
  0x44   :  { %1011 = vmatprep.subr.bf16.mxu1 %v1140_v18  ;;  %v86_v54 = vld [vmem:[#allocation2 + $0x28] sm:$0xff]  ;;  %v87_v57 = vld [vmem:[#allocation2 + $0x30] sm:$0xff]  ;;  %v1167_v59 = vld [vmem:[#allocation5 + $0x108] sm:$0xff]  }
  0x45   :  { %990 = vmatpush3.bf16.msra.mxu0 %v1139_v17  ;;  %v93_v56 = vpack.c.bf16 %v86_v54, %v86_v54  ;;  %v94_v58 = vpack.c.bf16 %v87_v57, %v87_v57  ;;  %v1168_v60 = vld [vmem:[#allocation5 + $0x140] sm:$0xff]   ;;  %v85_v62 = vld [vmem:[#allocation2 + $0x20] sm:$0xff]  ;;  %v1172_v1 = vld [vmem:[#allocation7 + $0x30] sm:$0xff]  }
  0x46   :  { %991 = vmatprep.subr.bf16.mxu0 %v1142_v20  ;;  %v1169_v61 = vld [vmem:[#allocation5 + $0x100] sm:$0xff]   ;;  %v92_v63 = vpack.c.bf16 %v85_v62, %v85_v62  ;;  %v1173_v2 = vld [vmem:[#allocation7 + $0x28] sm:$0xff]   ;;  %v1174_v3 = vld [vmem:[#allocation7 + $0x20] sm:$0xff]  }
  0x47   :  { %1012 = vmatpush3.bf16.msra.mxu1 %v1141_v19  ;;  %v1171_v0 = vld [vmem:[#allocation7 + $0x38] sm:$0xff]   ;;  %v1176_v5 = vld [vmem:[#allocation7 + $0x10] sm:$0xff]   ;;  %v1177_v6 = vld [vmem:[#allocation7 + $0x8] sm:$0xff]  }
  0x48   :  { %1013 = vmatprep.subr.bf16.mxu1 %v1144_v22  ;;  %v1175_v4 = vld [vmem:[#allocation7 + $0x18] sm:$0xff]   ;;  %v1178_v7 = vld [vmem:[#allocation7] sm:$0xff]   ;;  %v1180_v9 = vld [vmem:[#allocation8 + $0x30] sm:$0xff]  }
  0x49   :  { %992 = vmatpush3.bf16.msra.mxu0 %v1143_v21  ;;  %v1179_v8 = vld [vmem:[#allocation8 + $0x38] sm:$0xff]   ;;  %v1181_v10 = vld [vmem:[#allocation8 + $0x28] sm:$0xff]   ;;  %v1182_v11 = vld [vmem:[#allocation8 + $0x20] sm:$0xff]  }
  0x4a   :  { %993 = vmatprep.subr.bf16.mxu0 %v1146_v24  ;;  %v1183_v12 = vld [vmem:[#allocation8 + $0x18] sm:$0xff]   ;;  %v1184_v13 = vld [vmem:[#allocation8 + $0x10] sm:$0xff]   ;;  %v1185_v40 = vld [vmem:[#allocation8 + $0x8] sm:$0xff]  }
  0x4b   :  { %1014 = vmatpush3.bf16.msra.mxu1 %v1145_v23 }
  0x4c   :  { %1015 = vmatprep.subr.bf16.mxu1 %v1148_v26 }
  0x4d   :  { %994 = vmatpush3.bf16.msra.mxu0 %v1147_v25 }
  0x4e   :  { %995 = vmatprep.subr.bf16.mxu0 %v1150_v28 }
  0x4f   :  { %1016 = vmatpush3.bf16.msra.mxu1 %v1149_v27  ;;  %v912_v27 = vld [vmem:[%s1406_s2] ss:$0 sm:$0xff] }
  0x50   :  { %1017 = vmatprep.subr.bf16.mxu1 %v1152_v30 }
  0x51   :  { %996 = vmatpush3.bf16.msra.mxu0 %v1151_v29 }
  0x52   :  { %1025 = vmatprep.subr.bf16.mxu0 %v1154_v36 }
  0x53   :  { %1018 = vmatpush3.bf16.msra.mxu1 %v1153_v33 }
  0x54   :  { %531 = vmatmul.mubr.bf16.vlgmr.msra.gmra.mxu0 %v88_v35  ;;  %1067 = vmatprep.subr.bf16.mxu1 %v1305_v44 }
  0x55   :  { %1026 = vmatpush3.bf16.msra.mxu0 %v1155_v39  ;;  %610 = vmatprep.mubr.bf16.mxu0 %v93_v56 }
  0x56   :  { %571 = vmatmul.mubr.bf16.vlgmr.msra.gmra.mxu1 %v90_v41  ;;  %1027 = vmatprep.subr.bf16.mxu0 %v1156_v42  ;;  %v1186_v41 = vld [vmem:[#allocation8] sm:$0xff]  }
  0x57   :  { %1069 = vmatprep.mubr.msk.bf16.mxu1 %vm1306_vm0, %v1305_v44  ;;  %1068 = vmatpush3.bf16.msra.mxu1 %v1170_v53  ;;  %v963_v42 = vld [vmem:[%s1408_s4] ss:$0 sm:$0xff]  ;;  %s1307_s4 = smov [#allocation10]  }
  0x58   :  { %1073 = vmatprep.subr.bf16.mxu1 %v1305_v44  ;;  %s901_s24 = sshll.u32 %s1307_s4, 4  ;;  %s902_s24 = int_to_ptr.vmem [resolvable:$true] %s901_s24 }
  0x59   :  { %1028 = vmatpush3.bf16.msra.mxu0 %v1157_v43  ;;  %p1276_p7 = scmp.lt.s32.totalorder %s902_s24, %s902_s24 }
  0x5a   :  { %1029 = vmatprep.subr.bf16.mxu0 %v1158_v45 }
  0x5d   :  { %1030 = vmatpush3.bf16.msra.mxu0 %v1159_v46 }
  0x5e   :  { %1031 = vmatprep.subr.bf16.mxu0 %v1160_v47  ;;  %1070 = vmatmul.mubr.msk.bf16.vlgmr.msra.gmra.mxu1 %vm494_vm1, %v94_v58 }
  0x5f   :  { %1089 = vmatprep.mubr.msk.bf16.mxu1 %vm1306_vm0, %v1305_v44  ;;  %1074 = vmatpush3.bf16.msra.mxu1 %v1171_v0 }
  0x60   :  { %1075 = vmatprep.subr.bf16.mxu1 %v1305_v44 }
  0x61   :  { %1032 = vmatpush3.bf16.msra.mxu0 %v1161_v48 }
  0x62   :  { %1033 = vmatprep.subr.bf16.mxu0 %v1162_v49 }
  0x63   :  { %1076 = vmatpush3.bf16.msra.mxu1 %v1172_v1 }
  0x64   :  { %1077 = vmatprep.subr.bf16.mxu1 %v1305_v44 }
  0x65   :  { %1034 = vmatpush3.bf16.msra.mxu0 %v1163_v50 }
  0x66   :  { %1035 = vmatprep.subr.bf16.mxu0 %v1164_v51  ;;  %v972_v51 = vld [vmem:[%s1410_s6] ss:$0 sm:$0xff]  ;;  %s1271_s6 = scalar_lea.vmem %s902_s24, 128 }
  0x67   :  { %1078 = vmatpush3.bf16.msra.mxu1 %v1173_v2  ;;  %p1272_p6 = scmp.ne.s32.totalorder %s902_s24, %s1271_s6  ;;  %p1277_p8 = scmp.lt.s32.totalorder %s1271_s6, %s1271_s6 }
  0x68   :  { %1079 = vmatprep.subr.bf16.mxu1 %v1305_v44 }
  0x69   :  { %1036 = vmatpush3.bf16.msra.mxu0 %v1165_v52  ;;  %p1278_p9 = por %p1277_p8, %p1276_p7 }
  0x6a   :  { %1037 = vmatprep.subr.bf16.mxu0 %v1166_v55 }
  0x6b   :  { %1080 = vmatpush3.bf16.msra.mxu1 %v1174_v3  ;;  %p1279_p10 = pnand %p1278_p9, %p1272_p6 }
  0x6c   :  { %1081 = vmatprep.subr.bf16.mxu1 %v1305_v44 }
  0x6d   :  { %1038 = vmatpush3.bf16.msra.mxu0 %v1167_v59 }
  0x6e   :  { %1039 = vmatprep.subr.bf16.mxu0 %v1168_v60 }
  0x6f   :  { %1082 = vmatpush3.bf16.msra.mxu1 %v1175_v4 }
  0x70   :  { %1083 = vmatprep.subr.bf16.mxu1 %v1305_v44 }
  0x71   :  { %1040 = vmatpush3.bf16.msra.mxu0 %v1169_v61 }
  0x72   :  { %1093 = vmatprep.subr.bf16.mxu0 %v1305_v44 }
  0x73   :  { %1084 = vmatpush3.bf16.msra.mxu1 %v1176_v5 }
  0x74   :  { %611 = vmatmul.mubr.bf16.vlgmr.msra.gmra.mxu0 %v92_v63  ;;  %1085 = vmatprep.subr.bf16.mxu1 %v1305_v44 }
  0x75   :  { %1109 = vmatprep.mubr.msk.bf16.mxu0 %vm1306_vm0, %v1305_v44  ;;  %1094 = vmatpush3.bf16.msra.mxu0 %v1179_v8 }
  0x76   :  { %1095 = vmatprep.subr.bf16.mxu0 %v1305_v44 }
  0x77   :  { %1086 = vmatpush3.bf16.msra.mxu1 %v1177_v6 }
  0x78   :  { %1087 = vmatprep.subr.bf16.mxu1 %v1305_v44 }
  0x79   :  { %1096 = vmatpush3.bf16.msra.mxu0 %v1180_v9 }
  0x7a   :  { %1097 = vmatprep.subr.bf16.mxu0 %v1305_v44 }
  0x7b   :  { %1088 = vmatpush3.bf16.msra.mxu1 %v1178_v7 }
  0x7d   :  { %1098 = vmatpush3.bf16.msra.mxu0 %v1181_v10 }
  0x7e   :  { %1099 = vmatprep.subr.bf16.mxu0 %v1305_v44 }
  0x81   :  { %1100 = vmatpush3.bf16.msra.mxu0 %v1182_v11 }
  0x82   :  { %1101 = vmatprep.subr.bf16.mxu0 %v1305_v44 }
  0x85   :  { %1102 = vmatpush3.bf16.msra.mxu0 %v1183_v12 }
  0x86   :  { %1103 = vmatprep.subr.bf16.mxu0 %v1305_v44 }
  0x89   :  { %1104 = vmatpush3.bf16.msra.mxu0 %v1184_v13 }
  0x8a   :  { %1105 = vmatprep.subr.bf16.mxu0 %v1305_v44 }
  0x8d   :  { %1106 = vmatpush3.bf16.msra.mxu0 %v1185_v40 }
  0x8e   :  { %1107 = vmatprep.subr.bf16.mxu0 %v1305_v44 }
  0x91   :  { %1108 = vmatpush3.bf16.msra.mxu0 %v1186_v41 }
 0x114   :  { %v997_v14 = vpop.f32.mrf.mxu0 }
 0x116   :  { %v998_v15 = vpop.f32.mrf.mxu0  ;;  %v1019_v16 = vpop.f32.mrf.mxu1 }
 0x117   :  { %v999_v26 = vadd.f32 %v998_v15, %v997_v14 }
 0x118   :  { %v1000_v17 = vpop.f32.mrf.mxu0  ;;  %v1020_v18 = vpop.f32.mrf.mxu1 }
 0x119   :  { %v533_v28 = vadd.f32 %v999_v26, %v912_v27  ;;  %v1021_v29 = vadd.f32 %v1020_v18, %v1019_v16 }
 0x11a   :  { %v1001_v19 = vpop.f32.mrf.mxu0  ;;  %v1022_v20 = vpop.f32.mrf.mxu1 }
 0x11b   :  { %v573_v32 = vadd.f32 %v1021_v29, %v533_v28 }
 0x11c   :  { %v1023_v21 = vpop.f32.mrf.mxu1 }
 0x11e   :  { %v652_v22 = vpop.f32.mrf.mxu1 }
 0x120   :  { %v1071_v23 = vpop.f32.mrf.mxu1 }
 0x122   :  { %v655_v24 = vpop.f32.mrf.mxu1 }
 0x124   :  { %v1072_v25 = vpop.f32.mrf.mxu1 }
 0x134   :  { %v1041_v30 = vpop.f32.mrf.mxu0 }
 0x136   :  { %v1042_v31 = vpop.f32.mrf.mxu0 }
 0x137   :  { %v1043_v33 = vadd.f32 %v1042_v31, %v1041_v30 }
 0x138   :  { %v1044_v34 = vpop.f32.mrf.mxu0 }
 0x139   :  { %v613_v35 = vadd.f32 %v1043_v33, %v573_v32 }
 0x13a   :  { %v1045_v36 = vpop.f32.mrf.mxu0 }
 0x13b   :  { %v653_v37 = vadd.f32 %v652_v22, %v613_v35 }
 0x13d   :  { %v658_v38 = vmax.f32 %v653_v37, 0.0 }
 0x13f   :  { %v659_v39 = vpack.c.bf16 %v658_v38, %v658_v38 }
 0x141   :  { %1090 = vmatmul.mubr.bf16.vlgmr.msra.gmra.mxu1 %v659_v39 }
 0x201   :  { %v765_v43 = vpop.f32.mrf.mxu1 }
 0x202   :  { %v766_v45 = vadd.f32 %v963_v42, %v765_v43 }
 0x203   :  { %v1091_v46 = vpop.f32.mrf.mxu1 }
 0x204   :  { %v771_v47 = vmax.f32 %v766_v45, 0.0 }
 0x205   :  { %v768_v48 = vpop.f32.mrf.mxu1 }
 0x206   :  { %v772_v49 = vpack.c.bf16 %v771_v47, %v771_v47 }
 0x207   :  { %v1092_v50 = vpop.f32.mrf.mxu1 }
 0x208   :  { %1110 = vmatmul.mubr.bf16.vlgmr.msra.gmra.mxu0 %v772_v49 }
 0x2c8   :  { %v878_v52 = vpop.f32.mrf.mxu0 }
 0x2c9   :  { %v879_v44 = vadd.f32 %v972_v51, %v878_v52 }
 0x2ca   :  { %v1111_v53 = vpop.f32.mrf.mxu0 }
 0x2cb   :  { %884 = vmax.xlane.f32.xlu0 %v879_v44 }
 0x2cc   :  { %v881_v54 = vpop.f32.mrf.mxu0 }
 0x2ce   :  { %v1112_v55 = vpop.f32.mrf.mxu0 }
 0x354   :  { %v885_v56 = vpop.xlane.xlu0 %884 }
 0x355   :  { %v886_v57 = vsub.f32 %v879_v44, %v885_v56 }
 0x357   :  { %v887_v58 = vmul.f32 1.442695, %v886_v57 }
 0x359   :  { %1187 = vpow2.f32 %v887_v58 }
 0x366   :  { %v1188_v59 = vpop.eup %1187 }
 0x367   :  { %889 = vadd.xlane.f32.xlu0 %v1188_v59 }
 0x3f0   :  { %v890_v60 = vpop.xlane.xlu0 %889 }
 0x3f1   :  { %1189 = vlog2.f32 %v890_v60 }
 0x3fe   :  { %v1190_v61 = vpop.eup %1189 }
 0x3ff   :  { %v892_v62 = vmul.f32 0.6931472, %v1190_v61 }
 0x401   :  { %v893_v63 = vsub.f32 %v886_v57, %v892_v62 }
 0x403   :  { %894 = vst [vmem:[#allocation10] sm:$0xff] %v893_v63 }
 0x404   :  { %1282 = shalt.err (!%p1279_p10)
}
 0x405   :  { %904 = dma.vmem_to_hbm [thread:$0]  %s902_s24, 128, %s1411_s7, [#allocation4]  }
 0x406   :  { %1297 = dma.done.wait [#allocation4], 128  }
 0x407   :  { %1298 = vsyncadd [#allocation4], 4294967168 }
 0x408   :  { %908 = vsyncpa [#allocation3], 1 }
 0x409   :  { %909 = vsyncpa [#allocation6], 1 }
 0x40a   :  { %910 = vsyncpa [#allocation9], 1 }
 0x40b   :  { %911 = vsyncpa [#allocation4], 1 }

</bundles_post_ra>
